<compile_context>
chip_gen: v5e
topology: v5e:2x2
jax: 0.10.0
libtpu: 0.0.40
codegen_flags: <defaults>
</compile_context>

<pallas_src>
import jax
import jax.numpy as jnp
from jax.experimental import pallas as pl
from jax.experimental.pallas import tpu as pltpu


# ---------------------------------------------------------------------------
# Kernels
# ---------------------------------------------------------------------------

def _triplet_kernel(x1_ref, x2_ref, x3_ref, w1_ref, b1_ref, w2_ref, b2_ref, o_ref):
    # x*_ref: (B, D_in) f32      w1_ref: (D_in, H) bf16   b1_ref: (1, H)     f32
    #                            w2_ref: (H, D_out) bf16  b2_ref: (1, D_out) f32
    # o_ref : (3B, D_out) f32
    # Fold the triplet axis into the row dim inside the kernel (bf16 cast on
    # the VPU, tiny sublane concat in VMEM) -> one matmul chain, one store.
    x = jnp.concatenate(
        [x1_ref[...].astype(jnp.bfloat16),
         x2_ref[...].astype(jnp.bfloat16),
         x3_ref[...].astype(jnp.bfloat16)],
        axis=0,
    )
    h = jnp.dot(x, w1_ref[...], preferred_element_type=jnp.float32)
    h = jnp.maximum(h + b1_ref[...], 0.0)          # f32 bias + ReLU (v5e-safe)
    h = h.astype(jnp.bfloat16)                     # cast AFTER elementwise math
    o = jnp.dot(h, w2_ref[...], preferred_element_type=jnp.float32) + b2_ref[...]
    o_ref[...] = o                                 # single (3B, d_out) store


def _embed_kernel(x_ref, w1_ref, b1_ref, w2_ref, b2_ref, o_ref):
    # Single-branch version used by get_embedding.
    x = x_ref[...].astype(jnp.bfloat16)
    h = jnp.dot(x, w1_ref[...], preferred_element_type=jnp.float32)
    h = jnp.maximum(h + b1_ref[...], 0.0)
    h = h.astype(jnp.bfloat16)
    o_ref[...] = jnp.dot(h, w2_ref[...], preferred_element_type=jnp.float32) + b2_ref[...]


_VMEM = pl.BlockSpec(memory_space=pltpu.MemorySpace.VMEM)


# ---------------------------------------------------------------------------
# Params
# ---------------------------------------------------------------------------

def init_embedding_params(key, d_in, hidden, d_out):
    """Float32 master parameters (used by the pure-JAX reference)."""
    k1, k2, k3, k4 = jax.random.split(key, 4)
    w1 = jax.random.normal(k1, (d_in, hidden), jnp.float32) * (1.0 / jnp.sqrt(d_in))
    b1 = jax.random.normal(k2, (1, hidden), jnp.float32) * 0.01
    w2 = jax.random.normal(k3, (hidden, d_out), jnp.float32) * (1.0 / jnp.sqrt(hidden))
    b2 = jax.random.normal(k4, (1, d_out), jnp.float32) * 0.01
    return w1, b1, w2, b2


def prepare_device_params(params):
    """One-time pre-cast of the matmul weights to bf16 (kept across calls)."""
    w1, b1, w2, b2 = params
    return w1.astype(jnp.bfloat16), b1, w2.astype(jnp.bfloat16), b2


# ---------------------------------------------------------------------------
# Forward wrappers
# ---------------------------------------------------------------------------

@jax.jit
def triplet_net_forward(x1, x2, x3, device_params):
    """TripletNet.forward: shared embedding net on 3 inputs, 1 kernel call."""
    w1, b1, w2, b2 = device_params
    B = x1.shape[0]
    d_out = w2.shape[1]
    # Flatten NCHW -> (B, D_in): free view, no cast, no concat in the wrapper.
    x1f = x1.reshape(B, -1)
    x2f = x2.reshape(B, -1)
    x3f = x3.reshape(B, -1)
    out = pl.pallas_call(
        _triplet_kernel,
        out_shape=jax.ShapeDtypeStruct((3 * B, d_out), jnp.float32),
        # Whole-array blocks resident in VMEM; no grid -> single kernel step.
        in_specs=[_VMEM] * 7,
        out_specs=_VMEM,
    )(x1f, x2f, x3f, w1, b1, w2, b2)
    return out[:B], out[B:2 * B], out[2 * B:]


@jax.jit
def get_embedding(x, device_params):
    """TripletNet.get_embedding: embedding net on a single input."""
    w1, b1, w2, b2 = device_params
    B = x.shape[0]
    d_out = w2.shape[1]
    return pl.pallas_call(
        _embed_kernel,
        out_shape=jax.ShapeDtypeStruct((B, d_out), jnp.float32),
        in_specs=[_VMEM] * 5,
        out_specs=_VMEM,
    )(x.reshape(B, -1), w1, b1, w2, b2)


def triplet_net_reference(x1, x2, x3, params):
    """Pure-JAX (f32) reference for correctness check."""
    w1, b1, w2, b2 = params

    def embed(x):
        xf = x.reshape(x.shape[0], -1).astype(jnp.float32)
        h = jnp.maximum(xf @ w1 + b1, 0.0)
        return h @ w2 + b2

    return embed(x1), embed(x2), embed(x3)


# ---------------------------------------------------------------------------
# Main
# ---------------------------------------------------------------------------

if __name__ == "__main__":
    key = jax.random.PRNGKey(0)
    kx1, kx2, kx3, kp = jax.random.split(key, 4)

    # Small NCHW inputs: batch=2, channels=4, spatial=16x16.
    B, C, H, W = 2, 4, 16, 16
    x1 = jax.random.normal(kx1, (B, C, H, W), jnp.float32)
    x2 = jax.random.normal(kx2, (B, C, H, W), jnp.float32)
    x3 = jax.random.normal(kx3, (B, C, H, W), jnp.float32)

    d_in = C * H * W          # 1024
    hidden = 32
    d_out = 16
    params = init_embedding_params(kp, d_in, hidden, d_out)
    device_params = prepare_device_params(params)   # bf16 weights, cast once

    o1, o2, o3 = triplet_net_forward(x1, x2, x3, device_params)
    jax.block_until_ready((o1, o2, o3))

    # f32 reference; the kernel runs both matmuls in bf16 (f32 accumulation),
    # so allow a tolerance consistent with bf16 rounding over K=1024 and K=32.
    r1, r2, r3 = triplet_net_reference(x1, x2, x3, params)
    for got, ref in ((o1, r1), (o2, r2), (o3, r3)):
        assert got.shape == (B, d_out)
        assert jnp.max(jnp.abs(got - ref)) < 1e-1

    e1 = get_embedding(x1, device_params)
    jax.block_until_ready(e1)
    assert e1.shape == (B, d_out)
    assert jnp.max(jnp.abs(e1 - r1)) < 1e-1

    print("KERNEL_OK")
</pallas_src>

<mosaic_0001>
module attributes {stable_mosaic.version = 11 : i64} {
  func.func @_triplet_kernel(%arg0: memref<2x1024xf32, #tpu.memory_space<vmem>>, %arg1: memref<2x1024xf32, #tpu.memory_space<vmem>>, %arg2: memref<2x1024xf32, #tpu.memory_space<vmem>>, %arg3: memref<1024x32xbf16, #tpu.memory_space<vmem>>, %arg4: memref<1x32xf32, #tpu.memory_space<vmem>>, %arg5: memref<32x16xbf16, #tpu.memory_space<vmem>>, %arg6: memref<1x16xf32, #tpu.memory_space<vmem>>, %arg7: memref<6x16xf32, #tpu.memory_space<vmem>>) attributes {dimension_semantics = [], scalar_prefetch = 0 : i64, scratch_operands = 0 : i64, tpu.core_type = #tpu.core_type<tc>} {
    %c0 = arith.constant 0 : index
    %c0_0 = arith.constant 0 : index
    %0 = vector.load %arg0[%c0, %c0_0] : memref<2x1024xf32, #tpu.memory_space<vmem>>, vector<2x1024xf32>
    %1 = arith.truncf %0 : vector<2x1024xf32> to vector<2x1024xbf16>
    %c0_1 = arith.constant 0 : index
    %c0_2 = arith.constant 0 : index
    %2 = vector.load %arg1[%c0_1, %c0_2] : memref<2x1024xf32, #tpu.memory_space<vmem>>, vector<2x1024xf32>
    %3 = arith.truncf %2 : vector<2x1024xf32> to vector<2x1024xbf16>
    %c0_3 = arith.constant 0 : index
    %c0_4 = arith.constant 0 : index
    %4 = vector.load %arg2[%c0_3, %c0_4] : memref<2x1024xf32, #tpu.memory_space<vmem>>, vector<2x1024xf32>
    %5 = arith.truncf %4 : vector<2x1024xf32> to vector<2x1024xbf16>
    %6 = tpu.concatenate %1, %3, %5 in 0 : vector<2x1024xbf16>, vector<2x1024xbf16>, vector<2x1024xbf16> -> vector<6x1024xbf16>
    %c0_5 = arith.constant 0 : index
    %c0_6 = arith.constant 0 : index
    %7 = vector.load %arg3[%c0_5, %c0_6] : memref<1024x32xbf16, #tpu.memory_space<vmem>>, vector<1024x32xbf16>
    %cst = arith.constant dense<0.000000e+00> : vector<6x32xf32>
    %8 = tpu.matmul %6, %7, %cst {dimension_numbers = #tpu.dot_dimension_numbers<[1], [0], [0], [1], [0, 0, 1, 1], [], []>} : vector<6x1024xbf16>, vector<1024x32xbf16>, vector<6x32xf32> -> vector<6x32xf32>
    %c0_7 = arith.constant 0 : index
    %c0_8 = arith.constant 0 : index
    %9 = vector.load %arg4[%c0_7, %c0_8] : memref<1x32xf32, #tpu.memory_space<vmem>>, vector<1x32xf32>
    %10 = vector.broadcast %9 : vector<1x32xf32> to vector<6x32xf32>
    %11 = arith.addf %8, %10 : vector<6x32xf32>
    %cst_9 = arith.constant 0.000000e+00 : f32
    %12 = vector.broadcast %cst_9 : f32 to vector<6x32xf32>
    %13 = arith.maximumf %11, %12 : vector<6x32xf32>
    %14 = arith.truncf %13 : vector<6x32xf32> to vector<6x32xbf16>
    %c0_10 = arith.constant 0 : index
    %c0_11 = arith.constant 0 : index
    %15 = vector.load %arg5[%c0_10, %c0_11] : memref<32x16xbf16, #tpu.memory_space<vmem>>, vector<32x16xbf16>
    %cst_12 = arith.constant dense<0.000000e+00> : vector<6x16xf32>
    %16 = tpu.matmul %14, %15, %cst_12 {dimension_numbers = #tpu.dot_dimension_numbers<[1], [0], [0], [1], [0, 0, 1, 1], [], []>} : vector<6x32xbf16>, vector<32x16xbf16>, vector<6x16xf32> -> vector<6x16xf32>
    %c0_13 = arith.constant 0 : index
    %c0_14 = arith.constant 0 : index
    %17 = vector.load %arg6[%c0_13, %c0_14] : memref<1x16xf32, #tpu.memory_space<vmem>>, vector<1x16xf32>
    %18 = vector.broadcast %17 : vector<1x16xf32> to vector<6x16xf32>
    %19 = arith.addf %16, %18 : vector<6x16xf32>
    %c0_15 = arith.constant 0 : index
    %c0_16 = arith.constant 0 : index
    %20 = vector.load %arg7[%c0_15, %c0_16] : memref<6x16xf32, #tpu.memory_space<vmem>>, vector<6x16xf32>
    tpu.vector_store %arg7[%c0_15, %c0_16], %19 {strides = array<i32>} : memref<6x16xf32, #tpu.memory_space<vmem>>, vector<6x16xf32>,
    return
  }
}

</mosaic_0001>

<bundles_post_ra>
// kernel: triplet_net_forward.1
= control target key start
LH: loop header
LB: loop body
LE: loop exit
PB: predicated region body
PF: predicated region fallthrough
CT: control target
= control target key end

     0   :  { %vm184_vm0 = vcmask 1040384   ;;  %vm209_vm1 = vcmask 1041408   ;;  %vm876_vm2 = vcmask 261120   ;;  %vm893_vm3 = vcmask 128000   ;;  %s1533_s3 = inlined_call_operand.vmem [shape: bf16[1024,32], index: 3, kind: input, shape index: {}]   ;;  %s1534_s0 = inlined_call_operand.vmem [shape: f32[2,1024], index: 0, kind: input, shape index: {}]   ;;  %s1535_s4 = inlined_call_operand.vmem [shape: f32[1,32], index: 4, kind: input, shape index: {}]   ;;  %s1536_s1 = inlined_call_operand.vmem [shape: f32[2,1024], index: 1, kind: input, shape index: {}]   ;;  %s1537_s2 = inlined_call_operand.vmem [shape: f32[2,1024], index: 2, kind: input, shape index: {}]   ;;  %s1538_s6 = inlined_call_operand.vmem [shape: f32[1,16], index: 6, kind: input, shape index: {}]   ;;  %s1539_s5 = inlined_call_operand.vmem [shape: bf16[32,16], index: 5, kind: input, shape index: {}]   ;;  %s1540_s7 = inlined_call_operand.vmem [shape: f32[6,16], index: 7, kind: output, shape index: {}]  }
   0x1   :  { %v1171_v0 = vld [vmem:[%s1533_s3 + $0x38] sm:$0xff]  ;;  %v1170_v4 = vld [vmem:[%s1533_s3 + $0x30] sm:$0xff]  ;;  %v1169_v8 = vld [vmem:[%s1533_s3 + $0x28] sm:$0xff] }
   0x2   :  { %v1179_v1 = vld [vmem:[%s1533_s3 + $0x78] sm:$0xff]  ;;  %750 = vmatpush.bf16.msra.mxu0 %v1171_v0  ;;  %v1178_v5 = vld [vmem:[%s1533_s3 + $0x70] sm:$0xff]  ;;  %v1177_v9 = vld [vmem:[%s1533_s3 + $0x68] sm:$0xff] }
   0x3   :  { %v1187_v2 = vld [vmem:[%s1533_s3 + $0xb8] sm:$0xff]  ;;  %763 = vmatpush.bf16.msra.mxu1 %v1179_v1  ;;  %v1186_v6 = vld [vmem:[%s1533_s3 + $0xb0] sm:$0xff]  ;;  %v1185_v10 = vld [vmem:[%s1533_s3 + $0xa8] sm:$0xff] }
   0x4   :  { %v1195_v3 = vld [vmem:[%s1533_s3 + $0xf8] sm:$0xff]  ;;  %776 = vmatpush.bf16.msra.mxu2 %v1187_v2  ;;  %v1194_v7 = vld [vmem:[%s1533_s3 + $0xf0] sm:$0xff]  ;;  %v1193_v11 = vld [vmem:[%s1533_s3 + $0xe8] sm:$0xff] }
   0x5   :  { %789 = vmatpush.bf16.msra.mxu3 %v1195_v3  ;;  %v1168_v12 = vld [vmem:[%s1533_s3 + $0x20] sm:$0xff]  ;;  %v1167_v17 = vld [vmem:[%s1533_s3 + $0x18] sm:$0xff]  ;;  %v28_v19 = vld [vmem:[%s1534_s0 + $0x8] sm:$0xff] }
   0x6   :  { %751 = vmatpush.bf16.msra.mxu0 %v1170_v4  ;;  %v1176_v13 = vld [vmem:[%s1533_s3 + $0x60] sm:$0xff]  ;;  %v1175_v18 = vld [vmem:[%s1533_s3 + $0x58] sm:$0xff]  ;;  %33 = vst [vmem:[#allocation1 + $0x20] ss:$4 sm:$0xff] %v28_v19  ;;  %v1166_v22 = vld [vmem:[%s1533_s3 + $0x10] sm:$0xff] }
   0x7   :  { %764 = vmatpush.bf16.msra.mxu1 %v1178_v5  ;;  %v1184_v14 = vld [vmem:[%s1533_s3 + $0xa0] sm:$0xff]  ;;  %v1183_v20 = vld [vmem:[%s1533_s3 + $0x98] sm:$0xff]  ;;  %v1174_v23 = vld [vmem:[%s1533_s3 + $0x50] sm:$0xff] }
   0x8   :  { %777 = vmatpush.bf16.msra.mxu2 %v1186_v6  ;;  %v1192_v15 = vld [vmem:[%s1533_s3 + $0xe0] sm:$0xff]  ;;  %v1191_v21 = vld [vmem:[%s1533_s3 + $0xd8] sm:$0xff]  ;;  %v1182_v24 = vld [vmem:[%s1533_s3 + $0x90] sm:$0xff] }
   0x9   :  { %790 = vmatpush.bf16.msra.mxu3 %v1194_v7  ;;  %v27_v16 = vld [vmem:[%s1534_s0] sm:$0xff]  ;;  %v1190_v25 = vld [vmem:[%s1533_s3 + $0xd0] sm:$0xff]  ;;  %v1165_v26 = vld [vmem:[%s1533_s3 + $0x8] sm:$0xff] }
   0xa   :  { %752 = vmatpush.bf16.msra.mxu0 %v1169_v8  ;;  %31 = vst [vmem:[#allocation1] ss:$4 sm:$0xff] %v27_v16  ;;  %v1173_v27 = vld [vmem:[%s1533_s3 + $0x48] sm:$0xff]  ;;  %v54_v28 = vld [vmem:[%s1536_s1] sm:$0xff]  ;;  %v1203_v44 = vld [vmem:[%s1533_s3 + $0x138] sm:$0xff] }
   0xb   :  { %765 = vmatpush.bf16.msra.mxu1 %v1177_v9  ;;  %v1181_v33 = vld [vmem:[%s1533_s3 + $0x88] sm:$0xff]  ;;  %v1164_v35 = vld [vmem:[%s1533_s3] sm:$0xff]  ;;  %v1211_v45 = vld [vmem:[%s1533_s3 + $0x178] sm:$0xff] }
   0xc   :  { %778 = vmatpush.bf16.msra.mxu2 %v1185_v10  ;;  %v1189_v34 = vld [vmem:[%s1533_s3 + $0xc8] sm:$0xff]  ;;  %v1172_v36 = vld [vmem:[%s1533_s3 + $0x40] sm:$0xff]  ;;  %v1219_v46 = vld [vmem:[%s1533_s3 + $0x1b8] sm:$0xff] }
   0xd   :  { %791 = vmatpush.bf16.msra.mxu3 %v1193_v11  ;;  %v55_v37 = vld [vmem:[%s1536_s1 + $0x8] sm:$0xff]  ;;  %v1374_v38 = vld.sshfl [vmem:[#allocation1 + $0x20] sm:$0xff pattern:$0x73625140]  ;;  %v1227_v47 = vld [vmem:[%s1533_s3 + $0x1f8] sm:$0xff] }
   0xe   :  { %753 = vmatpush.bf16.msra.mxu0 %v1168_v12  ;;  %v1376_v39 = vld.sshfl [vmem:[#allocation1 + $0x28] sm:$0xff pattern:$0x73625140]  ;;  %v1378_v40 = vld.sshfl [vmem:[#allocation1 + $0x30] sm:$0xff pattern:$0x73625140] }
   0xf   :  { %766 = vmatpush.bf16.msra.mxu1 %v1176_v13  ;;  %v1380_v41 = vld.sshfl [vmem:[#allocation1 + $0x38] sm:$0xff pattern:$0x73625140]  ;;  %v1180_v42 = vld [vmem:[%s1533_s3 + $0x80] sm:$0xff]  ;;  %v1202_v55 = vld [vmem:[%s1533_s3 + $0x130] sm:$0xff] }
  0x10   :  { %779 = vmatpush.bf16.msra.mxu2 %v1184_v14  ;;  %v1188_v43 = vld [vmem:[%s1533_s3 + $0xc0] sm:$0xff]  ;;  %60 = vst [vmem:[#allocation1 + $0x20] ss:$4 sm:$0xff] %v55_v37  ;;  %v1210_v56 = vld [vmem:[%s1533_s3 + $0x170] sm:$0xff]  ;;  %v82_v61 = vld [vmem:[%s1537_s2 + $0x8] sm:$0xff] }
  0x11   :  { %792 = vmatpush.bf16.msra.mxu3 %v1192_v15  ;;  %v34_v29 = vld.sshfl [vmem:[#allocation1] sm:$0xff pattern:$0x73625140]  ;;  %v35_v30 = vld.sshfl [vmem:[#allocation1 + $0x8] sm:$0xff pattern:$0x73625140] }
  0x12   :  { %754 = vmatpush.bf16.msra.mxu0 %v1167_v17  ;;  %v36_v31 = vld.sshfl [vmem:[#allocation1 + $0x10] sm:$0xff pattern:$0x73625140]  ;;  %v37_v32 = vld.sshfl [vmem:[#allocation1 + $0x18] sm:$0xff pattern:$0x73625140]  ;;  %v50_v53 = vpack.c.bf16 %v35_v30, %v34_v29 }
  0x13   :  { %767 = vmatpush.bf16.msra.mxu1 %v1175_v18  ;;  %58 = vst [vmem:[#allocation1] ss:$4 sm:$0xff] %v54_v28  ;;  %v81_v48 = vld [vmem:[%s1537_s2] sm:$0xff]  ;;  %v51_v57 = vpack.c.bf16 %v37_v32, %v36_v31  ;;  %v1218_v59 = vld [vmem:[%s1533_s3 + $0x1b0] sm:$0xff]  ;;  %v1201_v10 = vld [vmem:[%s1533_s3 + $0x128] sm:$0xff] }
  0x14   :  { %780 = vmatpush.bf16.msra.mxu2 %v1183_v20  ;;  %v1226_v60 = vld [vmem:[%s1533_s3 + $0x1f0] sm:$0xff]  ;;  %v112_v4 = vunpack.c.l.b16 %v50_v53  ;;  %v113_v5 = vunpack.c.h.b16 %v50_v53  ;;  %v1209_v11 = vld [vmem:[%s1533_s3 + $0x168] sm:$0xff]  ;;  %v1200_v19 = vld [vmem:[%s1533_s3 + $0x120] sm:$0xff] }
  0x15   :  { %793 = vmatpush.bf16.msra.mxu3 %v1191_v21  ;;  %v114_v8 = vunpack.c.l.b16 %v51_v57  ;;  %v115_v12 = vunpack.c.h.b16 %v51_v57  ;;  %v1217_v13 = vld [vmem:[%s1533_s3 + $0x1a8] sm:$0xff]  ;;  %v1208_v20 = vld [vmem:[%s1533_s3 + $0x160] sm:$0xff] }
  0x16   :  { %755 = vmatpush.bf16.msra.mxu0 %v1166_v22  ;;  %v1225_v14 = vld [vmem:[%s1533_s3 + $0x1e8] sm:$0xff]  ;;  %v1216_v32 = vld [vmem:[%s1533_s3 + $0x1a0] sm:$0xff] }
  0x17   :  { %768 = vmatpush.bf16.msra.mxu1 %v1174_v23  ;;  %v65_v2 = vld.sshfl [vmem:[#allocation1 + $0x20] sm:$0xff pattern:$0x73625140]  ;;  %v66_v3 = vld.sshfl [vmem:[#allocation1 + $0x28] sm:$0xff pattern:$0x73625140]  ;;  %v120_v23 = vpack.c.b16 %v112_v4, %v112_v4  ;;  %v123_v29 = vpack.c.b16 %v115_v12, %v115_v12 }
  0x18   :  { %781 = vmatpush.bf16.msra.mxu2 %v1182_v24  ;;  %v67_v6 = vld.sshfl [vmem:[#allocation1 + $0x30] sm:$0xff pattern:$0x73625140]  ;;  %v68_v7 = vld.sshfl [vmem:[#allocation1 + $0x38] sm:$0xff pattern:$0x73625140]  ;;  %v121_v24 = vpack.c.b16 %v113_v5, %v113_v5 }
  0x19   :  { %794 = vmatpush.bf16.msra.mxu3 %v1190_v25  ;;  %87 = vst [vmem:[#allocation1 + $0x20] ss:$4 sm:$0xff] %v82_v61  ;;  %v1198_v4 = vld [vmem:[%s1533_s3 + $0x110] sm:$0xff] }
  0x1a   :  { %756 = vmatpush.bf16.msra.mxu0 %v1165_v26  ;;  %v61_v49 = vld.sshfl [vmem:[#allocation1] sm:$0xff pattern:$0x73625140]  ;;  %v62_v50 = vld.sshfl [vmem:[#allocation1 + $0x8] sm:$0xff pattern:$0x73625140]  ;;  %v122_v26 = vpack.c.b16 %v114_v8, %v114_v8 }
  0x1b   :  { %769 = vmatpush.bf16.msra.mxu1 %v1173_v27  ;;  %v63_v51 = vld.sshfl [vmem:[#allocation1 + $0x10] sm:$0xff pattern:$0x73625140]  ;;  %v64_v52 = vld.sshfl [vmem:[#allocation1 + $0x18] sm:$0xff pattern:$0x73625140]  ;;  %v77_v54 = vpack.c.bf16 %v62_v50, %v61_v49 }
  0x1c   :  { %782 = vmatpush.bf16.msra.mxu2 %v1181_v33  ;;  %v78_v58 = vpack.c.bf16 %v64_v52, %v63_v51  ;;  %85 = vst [vmem:[#allocation1] ss:$4 sm:$0xff] %v81_v48  ;;  %v1224_v33 = vld [vmem:[%s1533_s3 + $0x1e0] sm:$0xff]  ;;  %v1206_v5 = vld [vmem:[%s1533_s3 + $0x150] sm:$0xff] }
  0x1d   :  { %795 = vmatpush.bf16.msra.mxu3 %v1189_v34  ;;  %v132_v63 = vunpack.c.l.b16 %v77_v54  ;;  %v133_v1 = vunpack.c.h.b16 %v77_v54  ;;  %v1444_v34 = vpack.c.bf16 %v1376_v39, %v1374_v38  ;;  %v79_v38 = vpack.c.bf16 %v66_v3, %v65_v2 }
  0x1e   :  { %757 = vmatpush.bf16.msra.mxu0 %v1164_v35  ;;  %v134_v62 = vunpack.c.l.b16 %v78_v58  ;;  %v135_v0 = vunpack.c.h.b16 %v78_v58  ;;  %v1448_v35 = vpack.c.bf16 %v1380_v41, %v1378_v40  ;;  %v80_v39 = vpack.c.bf16 %v68_v7, %v67_v6 }
  0x1f   :  { %770 = vmatpush.bf16.msra.mxu1 %v1172_v36  ;;  %v140_v17 = vpack.c.b16 %v132_v63, %v132_v63  ;;  %v141_v18 = vpack.c.b16 %v133_v1, %v133_v1  ;;  %v1223_v63 = vld [vmem:[%s1533_s3 + $0x1d8] sm:$0xff]  ;;  %v136_v1 = vunpack.c.l.b16 %v79_v38  ;;  %v137_v6 = vunpack.c.h.b16 %v79_v38  ;;  %v1212_v38 = vld [vmem:[%s1533_s3 + $0x180] sm:$0xff] }
  0x20   :  { %783 = vmatpush.bf16.msra.mxu2 %v1180_v42  ;;  %v142_v9 = vpack.c.b16 %v134_v62, %v134_v62  ;;  %v143_v15 = vpack.c.b16 %v135_v0, %v135_v0  ;;  %v92_v49 = vld.sshfl [vmem:[#allocation1 + $0x20] sm:$0xff pattern:$0x73625140]  ;;  %v93_v50 = vld.sshfl [vmem:[#allocation1 + $0x28] sm:$0xff pattern:$0x73625140]  ;;  %v116_v12 = vunpack.c.l.b16 %v1444_v34 }
  0x21   :  { %796 = vmatpush.bf16.msra.mxu3 %v1188_v43  ;;  %v148_v37 = vrot.slane %v140_v17, 7  ;;  %v149_v43 = vrot.slane %v141_v18, 7  ;;  %v94_v54 = vld.sshfl [vmem:[#allocation1 + $0x30] sm:$0xff pattern:$0x73625140]  ;;  %v1215_v62 = vld [vmem:[%s1533_s3 + $0x198] sm:$0xff]  ;;  %v106_v0 = vpack.c.bf16 %v93_v50, %v92_v49 }
  0x22   :  { %802 = vmatpush.bf16.msrb.mxu0 %v1203_v44  ;;  %v150_v16 = vrot.slane %v142_v9, 7  ;;  %v151_v31 = vrot.slane %v143_v15, 7  ;;  %v1197_v18 = vld [vmem:[%s1533_s3 + $0x108] sm:$0xff] }
  0x23   :  { %815 = vmatpush.bf16.msrb.mxu1 %v1211_v45  ;;  %v90_v21 = vld.sshfl [vmem:[#allocation1 + $0x10] sm:$0xff pattern:$0x73625140]  ;;  %v91_v22 = vld.sshfl [vmem:[#allocation1 + $0x18] sm:$0xff pattern:$0x73625140]  ;;  %v187_v57 = vsel %vm184_vm0, %v120_v23, %v148_v37  ;;  %v164_v15 = vunpack.c.l.b16 %v106_v0  ;;  %v165_v17 = vunpack.c.h.b16 %v106_v0 }
  0x24   :  { %828 = vmatpush.bf16.msrb.mxu2 %v1219_v46  ;;  %v105_v25 = vpack.c.bf16 %v91_v22, %v90_v21  ;;  %v88_v27 = vld.sshfl [vmem:[#allocation1] sm:$0xff pattern:$0x73625140]  ;;  %v89_v28 = vld.sshfl [vmem:[#allocation1 + $0x8] sm:$0xff pattern:$0x73625140]  ;;  %v193_v40 = vsel %vm184_vm0, %v122_v26, %v150_v16  ;;  %v196_v52 = vsel %vm184_vm0, %v123_v29, %v151_v31  ;;  %v117_v16 = vunpack.c.h.b16 %v1444_v34 }
  0x25   :  { %841 = vmatpush.bf16.msrb.mxu3 %v1227_v47  ;;  %v104_v30 = vpack.c.bf16 %v89_v28, %v88_v27  ;;  %v1199_v46 = vld [vmem:[%s1533_s3 + $0x118] sm:$0xff]  ;;  %v145_v21 = vpack.c.b16 %v137_v6, %v137_v6  ;;  %v119_v26 = vunpack.c.h.b16 %v1448_v35  ;;  %v124_v28 = vpack.c.b16 %v116_v12, %v116_v12  ;;  %v1213_v29 = vld [vmem:[%s1533_s3 + $0x188] sm:$0xff]  ;;  %v1196_v34 = vld [vmem:[%s1533_s3 + $0x100] sm:$0xff] }
  0x26   :  { %803 = vmatpush.bf16.msrb.mxu0 %v1202_v55  ;;  %v162_v36 = vunpack.c.l.b16 %v105_v25  ;;  %v163_v42 = vunpack.c.h.b16 %v105_v25  ;;  %v1207_v47 = vld [vmem:[%s1533_s3 + $0x158] sm:$0xff]  ;;  %v172_v31 = vpack.c.b16 %v164_v15, %v164_v15 }
  0x27   :  { %816 = vmatpush.bf16.msrb.mxu1 %v1210_v56  ;;  %v160_v44 = vunpack.c.l.b16 %v104_v30  ;;  %v161_v45 = vunpack.c.h.b16 %v104_v30  ;;  %v95_v55 = vld.sshfl [vmem:[#allocation1 + $0x38] sm:$0xff pattern:$0x73625140]  ;;  %v1221_v30 = vld [vmem:[%s1533_s3 + $0x1c8] sm:$0xff]  ;;  %v153_v37 = vrot.slane %v145_v21, 7 }
  0x28   :  { %829 = vmatpush.bf16.msrb.mxu2 %v1218_v59  ;;  %v170_v48 = vpack.c.b16 %v162_v36, %v162_v36  ;;  %v171_v41 = vpack.c.b16 %v163_v42, %v163_v42  ;;  %v190_v59 = vsel %vm184_vm0, %v121_v24, %v149_v43  ;;  %v107_v7 = vpack.c.bf16 %v95_v55, %v94_v54 }
  0x29   :  { %842 = vmatpush.bf16.msrb.mxu3 %v1226_v60  ;;  %v168_v51 = vpack.c.b16 %v160_v44, %v160_v44  ;;  %v169_v53 = vpack.c.b16 %v161_v45, %v161_v45  ;;  %v118_v24 = vunpack.c.l.b16 %v1448_v35  ;;  %v1204_v35 = vld [vmem:[%s1533_s3 + $0x140] sm:$0xff] }
  0x2a   :  { %804 = vmatpush.bf16.msrb.mxu0 %v1201_v10  ;;  %v178_v56 = vrot.slane %v170_v48, 6  ;;  %v179_v58 = vrot.slane %v171_v41, 6  ;;  %v138_v10 = vunpack.c.l.b16 %v80_v39  ;;  %v166_v22 = vunpack.c.l.b16 %v107_v7 }
  0x2b   :  { %817 = vmatpush.bf16.msrb.mxu1 %v1209_v11  ;;  %v176_v60 = vrot.slane %v168_v51, 6  ;;  %v177_v61 = vrot.slane %v169_v53, 6  ;;  %v139_v11 = vunpack.c.h.b16 %v80_v39  ;;  %v167_v23 = vunpack.c.h.b16 %v107_v7  ;;  %v1220_v39 = vld [vmem:[%s1533_s3 + $0x1c0] sm:$0xff] }
  0x2c   :  { %830 = vmatpush.bf16.msrb.mxu2 %v1217_v13  ;;  %v217_v2 = vsel %vm209_vm1, %v193_v40, %v178_v56  ;;  %v220_v3 = vsel %vm209_vm1, %v196_v52, %v179_v58  ;;  %v1214_v13 = vld [vmem:[%s1533_s3 + $0x190] sm:$0xff]  ;;  %v146_v25 = vpack.c.b16 %v138_v10, %v138_v10  ;;  %v174_v42 = vpack.c.b16 %v166_v22, %v166_v22  ;;  %v1229_v58 = vld [vmem:[%s1539_s5 + $0x8] sm:$0xff] }
  0x2d   :  { %843 = vmatpush.bf16.msrb.mxu3 %v1225_v14  ;;  %784 = vmatmul.bf16.vlgmr.msra.gmra.mxu2 %v217_v2  ;;  %v211_v8 = vsel %vm209_vm1, %v187_v57, %v176_v60  ;;  %v214_v9 = vsel %vm209_vm1, %v190_v59, %v177_v61  ;;  %v1222_v14 = vld [vmem:[%s1533_s3 + $0x1d0] sm:$0xff]  ;;  %v147_v27 = vpack.c.b16 %v139_v11, %v139_v11  ;;  %v180_v48 = vrot.slane %v172_v31, 6  ;;  %v1228_v59 = vld [vmem:[%s1539_s5] sm:$0xff] }
  0x2e   :  { %805 = vmatpush.bf16.msrb.mxu0 %v1200_v19  ;;  %797 = vmatmul.bf16.vlgmr.msra.gmra.mxu3 %v220_v3  ;;  %v1205_v19 = vld [vmem:[%s1533_s3 + $0x148] sm:$0xff]  ;;  %v175_v43 = vpack.c.b16 %v167_v23, %v167_v23  ;;  %v126_v44 = vpack.c.b16 %v118_v24, %v118_v24  ;;  %v154_v45 = vrot.slane %v146_v25, 7  ;;  %v182_v50 = vrot.slane %v174_v42, 6  ;;  %v1230_v60 = vld [vmem:[%s1535_s4] ss:$0 sm:$0xff] }
  0x2f   :  { %818 = vmatpush.bf16.msrb.mxu1 %v1208_v20  ;;  %758 = vmatmul.bf16.vlgmr.msra.gmra.mxu0 %v211_v8  ;;  %v144_v20 = vpack.c.b16 %v136_v1, %v136_v1  ;;  %v1231_v23 = vld [vmem:[%s1538_s6] ss:$0 sm:$0xff] }
  0x30   :  { %831 = vmatpush.bf16.msrb.mxu2 %v1216_v32  ;;  %771 = vmatmul.bf16.vlgmr.msra.gmra.mxu1 %v214_v9  ;;  %v125_v32 = vpack.c.b16 %v117_v16, %v117_v16  ;;  %v183_v51 = vrot.slane %v175_v43, 6  ;;  %v205_v52 = vsel %vm184_vm0, %v126_v44, %v154_v45 }
  0x31   :  { %844 = vmatpush.bf16.msrb.mxu3 %v1224_v33  ;;  %v173_v33 = vpack.c.b16 %v165_v17, %v165_v17  ;;  %v152_v36 = vrot.slane %v144_v20, 7  ;;  %v229_v56 = vsel %vm209_vm1, %v205_v52, %v182_v50 }
  0x32   :  { %806 = vmatpush.bf16.msrb.mxu0 %v1199_v46  ;;  %v127_v46 = vpack.c.b16 %v119_v26, %v119_v26  ;;  %v202_v49 = vsel %vm184_vm0, %v125_v32, %v153_v37 }
  0x33   :  { %819 = vmatpush.bf16.msrb.mxu1 %v1207_v47  ;;  %v155_v47 = vrot.slane %v147_v27, 7  ;;  %v181_v40 = vrot.slane %v173_v33, 6  ;;  %v199_v41 = vsel %vm184_vm0, %v124_v28, %v152_v36 }
  0x34   :  { %832 = vmatpush.bf16.msrb.mxu2 %v1215_v62  ;;  %v223_v54 = vsel %vm209_vm1, %v199_v41, %v180_v48 }
  0x35   :  { %845 = vmatpush.bf16.msrb.mxu3 %v1223_v63  ;;  %v208_v53 = vsel %vm184_vm0, %v127_v46, %v155_v47  ;;  %v226_v55 = vsel %vm209_vm1, %v202_v49, %v181_v40 }
  0x36   :  { %807 = vmatpush.bf16.msrb.mxu0 %v1198_v4  ;;  %v232_v57 = vsel %vm209_vm1, %v208_v53, %v183_v51 }
  0x37   :  { %820 = vmatpush.bf16.msrb.mxu1 %v1206_v5 }
  0x38   :  { %833 = vmatpush.bf16.msrb.mxu2 %v1214_v13 }
  0x39   :  { %846 = vmatpush.bf16.msrb.mxu3 %v1222_v14 }
  0x3a   :  { %808 = vmatpush.bf16.msrb.mxu0 %v1197_v18 }
  0x3b   :  { %821 = vmatpush.bf16.msrb.mxu1 %v1205_v19 }
  0x3c   :  { %834 = vmatpush.bf16.msrb.mxu2 %v1213_v29 }
  0x3d   :  { %847 = vmatpush.bf16.msrb.mxu3 %v1221_v30 }
  0x3e   :  { %809 = vmatpush.bf16.msrb.mxu0 %v1196_v34 }
  0x3f   :  { %822 = vmatpush.bf16.msrb.mxu1 %v1204_v35 }
  0x40   :  { %835 = vmatpush.bf16.msrb.mxu2 %v1212_v38 }
  0x41   :  { %848 = vmatpush.bf16.msrb.mxu3 %v1220_v39  ;;  %810 = vmatmul.bf16.vlgmr.msrb.gmra.mxu0 %v223_v54 }
  0x42   :  { %823 = vmatmul.bf16.vlgmr.msrb.gmra.mxu1 %v226_v55  ;;  %886 = vmatpush.bf16.msra.mxu0 %v1229_v58 }
  0x43   :  { %836 = vmatmul.bf16.vlgmr.msrb.gmra.mxu2 %v229_v56 }
  0x44   :  { %849 = vmatmul.bf16.vlgmr.msrb.gmra.mxu3 %v232_v57 }
  0x46   :  { %887 = vmatpush.bf16.msra.mxu0 %v1228_v59 }
  0xac   :  { %v759_v61 = vpop.f32.mrf.mxu0 }
  0xad   :  { %v772_v62 = vpop.f32.mrf.mxu1  ;;  %v760_v63 = vadd.f32 %v1230_v60, %v759_v61 }
  0xaf   :  { %v773_v2 = vadd.f32 %v772_v62, %v760_v63 }
  0xb0   :  { %v785_v0 = vpop.f32.mrf.mxu2 }
  0xb1   :  { %v798_v1 = vpop.f32.mrf.mxu3  ;;  %v786_v5 = vadd.f32 %v785_v0, %v773_v2 }
  0xb3   :  { %v799_v8 = vadd.f32 %v798_v1, %v786_v5 }
  0xb4   :  { %v761_v3 = vpop.f32.mrf.mxu0 }
  0xb5   :  { %v774_v4 = vpop.f32.mrf.mxu1 }
  0xb8   :  { %v787_v6 = vpop.f32.mrf.mxu2 }
  0xb9   :  { %v800_v7 = vpop.f32.mrf.mxu3 }
  0xbe   :  { %v811_v9 = vpop.f32.mrf.mxu0 }
  0xbf   :  { %v824_v10 = vpop.f32.mrf.mxu1  ;;  %v812_v11 = vadd.f32 %v811_v9, %v799_v8 }
  0xc1   :  { %v825_v12 = vadd.f32 %v824_v10, %v812_v11 }
  0xc6   :  { %v837_v13 = vpop.f32.mrf.mxu2  ;;  %v813_v16 = vpop.f32.mrf.mxu0 }
  0xc7   :  { %v850_v14 = vpop.f32.mrf.mxu3  ;;  %v838_v15 = vadd.f32 %v837_v13, %v825_v12  ;;  %v826_v17 = vpop.f32.mrf.mxu1 }
  0xc9   :  { %v851_v18 = vadd.f32 %v850_v14, %v838_v15 }
  0xcb   :  { %v854_v19 = vmax.f32 %v851_v18, 0.0 }
  0xcd   :  { %v855_v20 = vpack.c.bf16 %v854_v19, %v854_v19 }
  0xce   :  { %v839_v21 = vpop.f32.mrf.mxu2 }
  0xcf   :  { %v852_v22 = vpop.f32.mrf.mxu3  ;;  %1163 = vmatmul.msk.bf16.vlgmr.msra.gmra.mxu0 %vm876_vm2, %v855_v20 }
 0x14c   :  { %v889_v24 = vpop.f32.mrf.mxu0 }
 0x14d   :  { %v890_v25 = vadd.f32 %v1231_v23, %v889_v24 }
 0x14f   :  { %894 = vst.msk [vmem:[%s1540_s7] sm:$0x3f] %vm893_vm3, %v890_v25 }
 0x154   :  { %v891_v26 = vpop.f32.mrf.mxu0 }

</bundles_post_ra>
